<compile_context>
chip_gen: v5e
topology: v5e:2x2
jax: 0.10.0
libtpu: 0.0.40
codegen_flags: <defaults>
</compile_context>

<pallas_src>
import functools

import jax
import jax.numpy as jnp
from jax.experimental import pallas as pl
from jax.experimental.pallas import tpu as pltpu


def _pick_m_block(M_pad, Cin, Cout_pad, T, T_tot, R, budget_bytes=12 * 2**20):
    """Largest lane tile (multiple of 128 dividing M_pad) fitting a VMEM budget.

    Prefers >= 2 tiles when M allows so both v7x TensorCores get work.
    """
    cap = M_pad if M_pad < 256 else M_pad // 2
    best = 128
    m = 128
    while m <= cap:
        if M_pad % m == 0:
            need = (2 * Cin * T * m * 2            # x tile, bf16, double-buffered
                    + 2 * Cout_pad * T_tot * m * 4  # out tile, f32, double-buffered
                    + R * T * m * 4)                # big-dot f32 intermediate
            if need <= budget_bytes:
                best = m
        m += 128
    return best


def _make_fused_kernel(T, m_blk, dilations, cout_pad):
    """Build the fused kernel; all layer/tap loops unroll at trace time (static)."""
    t_outs = [T - 2 * d for d in dilations]

    def kernel(x_ref, w_ref, b_ref, o_ref):
        # x_ref : (1, Cin, T*m_blk)             bf16  one lane tile of the input
        # w_ref : (L*3*cout_pad, Cin)           bf16  BN-folded weights, all layers/taps
        # b_ref : (L, cout_pad, 1)              f32   BN-folded bias
        # o_ref : (1, cout_pad, T_tot*m_blk)    f32   concatenated output tile
        #
        # One MXU pass: every (layer, tap, out-channel) row against the whole tile,
        # f32 accumulation.
        big = jnp.dot(w_ref[...], x_ref[0], preferred_element_type=jnp.float32)
        col = 0
        for l, (d, t_out) in enumerate(zip(dilations, t_outs)):
            width = t_out * m_blk                      # multiple of 128 -> lane aligned
            base = l * 3 * cout_pad                    # multiple of 8   -> sublane aligned
            # Tap k reads lane columns shifted by k*d*m_blk (lane-aligned VPU adds).
            y = big[base:base + cout_pad, 0:width]
            for k in (1, 2):
                off = k * d * m_blk
                y = y + big[base + k * cout_pad:base + (k + 1) * cout_pad,
                            off:off + width]
            # f32 bias + ReLU epilogue, one unmasked lane-dense store.
            y = jnp.maximum(y + b_ref[l], 0.0)
            o_ref[0, :, col:col + width] = y.astype(o_ref.dtype)
            col += width

    return kernel


def dilation_block_forward(x_ncthw, conv_weights, bn_params, step=1,
                           compute_dtype=jnp.bfloat16):
    """Pallas implementation of DilationBlock.forward (WS=False, eval-mode BN).

    x_ncthw      : (N, C_in, T, H, W) float32
    conv_weights : list of (C_out, C_in, 3, 1, 1) per layer
    bn_params    : list of (gamma, beta, running_mean, running_var) per layer
    returns      : (N, C_out, sum_n(T - 2*(n*step+1)), H, W) float32
    """
    N, Cin, T, H, W = x_ncthw.shape
    L = len(conv_weights)
    Cout = conv_weights[0].shape[0]
    dilations = [n * step + 1 for n in range(L)]
    t_outs = [T - 2 * d for d in dilations]
    assert all(t > 0 for t in t_outs), t_outs
    T_tot = sum(t_outs)

    M = N * H * W
    M_pad = ((M + 127) // 128) * 128          # lane-dense layout requires M % 128 == 0
    Cout_pad = ((Cout + 7) // 8) * 8          # keep >= 8 sublanes, never split below 8
    R = L * 3 * Cout_pad                      # big-dot LHS rows (72 at toy sizes)

    # --- fold eval-mode BatchNorm into conv weights / bias; pack one (R, Cin) LHS ---
    w_rows, b_rows = [], []
    for w, (gamma, beta, mean, var) in zip(conv_weights, bn_params):
        scale = gamma / jnp.sqrt(var + 1e-5)                       # (Cout,)
        shift = beta - mean * scale                                # (Cout,)
        wk = jnp.transpose(w[:, :, :, 0, 0], (2, 0, 1)) * scale[None, :, None]  # (3,Cout,Cin)
        wk = jnp.pad(wk, ((0, 0), (0, Cout_pad - Cout), (0, 0)))
        w_rows.append(wk)
        b_rows.append(jnp.pad(shift, (0, Cout_pad - Cout)))
    w_big = jnp.concatenate(w_rows, axis=0).reshape(R, Cin).astype(compute_dtype)
    b_all = jnp.stack(b_rows, axis=0).reshape(L, Cout_pad, 1).astype(jnp.float32)

    # --- input: NCDHW -> (Cin, T, M) bf16, lane-padded, pre-blocked along M ---
    x_ctm = jnp.transpose(x_ncthw.astype(compute_dtype), (1, 2, 0, 3, 4)).reshape(Cin, T, M)
    if M_pad != M:
        x_ctm = jnp.pad(x_ctm, ((0, 0), (0, 0), (0, M_pad - M)))
    m_blk = _pick_m_block(M_pad, Cin, Cout_pad, T, T_tot, R)
    num_m = M_pad // m_blk
    x_blk = (x_ctm.reshape(Cin, T, num_m, m_blk)
             .transpose(2, 0, 1, 3)
             .reshape(num_m, Cin, T * m_blk))

    kernel = _make_fused_kernel(T, m_blk, dilations, Cout_pad)

    # VMEM sizing (explicit, leaves headroom; v7x has only 64 MiB physical).
    vmem_need = (2 * Cin * T * m_blk * 2
                 + 2 * Cout_pad * T_tot * m_blk * 4
                 + R * T * m_blk * 4
                 + R * Cin * 2 + L * Cout_pad * 4)
    vmem_limit = int(min(max(2 * vmem_need, 8 * 2**20), 48 * 2**20))

    flops = 2 * R * Cin * T * M_pad
    bytes_accessed = (num_m * Cin * T * m_blk * 2          # x (bf16)
                      + R * Cin * 2 + L * Cout_pad * 4     # weights / bias
                      + num_m * Cout_pad * T_tot * m_blk * 4)  # out (f32)
    cost = pl.CostEstimate(flops=int(flops), transcendentals=0,
                           bytes_accessed=int(bytes_accessed))

    out = pl.pallas_call(
        kernel,
        out_shape=jax.ShapeDtypeStruct((num_m, Cout_pad, T_tot * m_blk), jnp.float32),
        grid_spec=pltpu.PrefetchScalarGridSpec(
            num_scalar_prefetch=0,
            grid=(num_m,),
            in_specs=[
                pl.BlockSpec((1, Cin, T * m_blk), lambda j: (j, 0, 0)),
                pl.BlockSpec((R, Cin), lambda j: (0, 0)),
                pl.BlockSpec((L, Cout_pad, 1), lambda j: (0, 0, 0)),
            ],
            out_specs=pl.BlockSpec((1, Cout_pad, T_tot * m_blk), lambda j: (j, 0, 0)),
        ),
        compiler_params=pltpu.CompilerParams(
            dimension_semantics=("parallel",),
            vmem_limit_bytes=vmem_limit,
        ),
        cost_estimate=cost,
    )(x_blk, w_big, b_all)

    # (num_m, Cout_pad, T_tot*m_blk) -> (N, Cout, T_tot, H, W)
    out = out.reshape(num_m, Cout_pad, T_tot, m_blk)[:, :Cout]
    out = out.transpose(1, 2, 0, 3).reshape(Cout, T_tot, M_pad)[:, :, :M]
    out = out.reshape(Cout, T_tot, N, H, W).transpose(2, 0, 1, 3, 4)
    return out


def dilation_block_reference(x_ncthw, conv_weights, bn_params, step=1):
    """Pure-JAX f32 reference mirroring the PyTorch forward (WS=False, eval-mode BN)."""
    outs = []
    for n, (w, (gamma, beta, mean, var)) in enumerate(zip(conv_weights, bn_params)):
        d = n * step + 1
        T = x_ncthw.shape[2]
        T_out = T - 2 * d
        y = jnp.zeros(
            (x_ncthw.shape[0], w.shape[0], T_out, x_ncthw.shape[3], x_ncthw.shape[4]),
            jnp.float32,
        )
        for k in range(3):
            xs = x_ncthw[:, :, k * d: k * d + T_out]
            y = y + jnp.einsum("ncthw,oc->nothw", xs, w[:, :, k, 0, 0])
        scale = gamma / jnp.sqrt(var + 1e-5)
        shift = beta - mean * scale
        y = y * scale[None, :, None, None, None] + shift[None, :, None, None, None]
        outs.append(jnp.maximum(y, 0.0))
    return jnp.concatenate(outs, axis=2)


if __name__ == "__main__":
    # Small shapes consistent with the module: Conv3d input is (N, C_in, T, H, W).
    N, in_ch, out_ch, T, H, W = 2, 4, 8, 16, 8, 8
    num_layer, step = 3, 1

    key = jax.random.PRNGKey(0)
    x = jax.random.normal(key, (N, in_ch, T, H, W), dtype=jnp.float32)

    conv_weights = []
    bn_params = []
    for n in range(num_layer):
        key, wk = jax.random.split(key)
        fan_in = in_ch * 3
        w = jax.random.normal(wk, (out_ch, in_ch, 3, 1, 1), jnp.float32) / jnp.sqrt(
            jnp.float32(fan_in)
        )
        conv_weights.append(w)
        # BatchNorm3d init-time parameters / running stats (gamma, beta, mean, var).
        bn_params.append(
            (
                jnp.ones((out_ch,), jnp.float32),
                jnp.zeros((out_ch,), jnp.float32),
                jnp.zeros((out_ch,), jnp.float32),
                jnp.ones((out_ch,), jnp.float32),
            )
        )

    fwd = jax.jit(functools.partial(dilation_block_forward, step=step))
    out = jax.block_until_ready(fwd(x, conv_weights, bn_params))

    ref = dilation_block_reference(x, conv_weights, bn_params, step=step)
    expected_T = sum(T - 2 * (n * step + 1) for n in range(num_layer))
    assert out.shape == (N, out_ch, expected_T, H, W), out.shape
    max_err = float(jnp.max(jnp.abs(out - ref)))
    # bf16 streamed operands (f32 accumulation/epilogue) -> tolerance loosened vs f32.
    assert jnp.allclose(out, ref, atol=2e-2, rtol=2e-2), max_err
    print("KERNEL_OK")
</pallas_src>

<mosaic_0001>
module attributes {stable_mosaic.version = 11 : i64} {
  func.func @kernel(%arg0: i32, %arg1: memref<1x4x2048xbf16, #tpu.memory_space<vmem>>, %arg2: memref<72x4xbf16, #tpu.memory_space<vmem>>, %arg3: memref<3x8x1xf32, #tpu.memory_space<vmem>>, %arg4: memref<1x8x4608xf32, #tpu.memory_space<vmem>>) attributes {dimension_semantics = [#tpu.dimension_semantics<parallel>], iteration_bounds = array<i64: 1>, scalar_prefetch = 0 : i64, scratch_operands = 0 : i64, tpu.core_type = #tpu.core_type<tc>, window_params = [{transform_indices = @transform_0, window_bounds = array<i64: 1, 4, 2048>}, {pipeline_mode = #tpu.pipeline_mode<synchronous>, transform_indices = @transform_1, window_bounds = array<i64: 72, 4>}, {pipeline_mode = #tpu.pipeline_mode<synchronous>, transform_indices = @transform_2, window_bounds = array<i64: 3, 8, 1>}, {transform_indices = @transform_3, window_bounds = array<i64: 1, 8, 4608>}]} {
    %c0 = arith.constant 0 : index
    %c0_0 = arith.constant 0 : index
    %0 = vector.load %arg2[%c0, %c0_0] : memref<72x4xbf16, #tpu.memory_space<vmem>>, vector<72x4xbf16>
    %c0_1 = arith.constant 0 : index
    %c0_2 = arith.constant 0 : index
    %c0_3 = arith.constant 0 : index
    %1 = vector.load %arg1[%c0_1, %c0_2, %c0_3] : memref<1x4x2048xbf16, #tpu.memory_space<vmem>>, vector<1x4x2048xbf16>
    %2 = vector.shape_cast %1 : vector<1x4x2048xbf16> to vector<4x2048xbf16>
    %cst = arith.constant dense<0.000000e+00> : vector<72x2048xf32>
    %3 = tpu.matmul %0, %2, %cst {dimension_numbers = #tpu.dot_dimension_numbers<[1], [0], [0], [1], [0, 0, 1, 1], [], []>} : vector<72x4xbf16>, vector<4x2048xbf16>, vector<72x2048xf32> -> vector<72x2048xf32>
    %4 = vector.extract_strided_slice %3 {offsets = [0, 0], sizes = [8, 1792], strides = [1, 1]} : vector<72x2048xf32> to vector<8x1792xf32>
    %5 = vector.extract_strided_slice %3 {offsets = [8, 128], sizes = [8, 1792], strides = [1, 1]} : vector<72x2048xf32> to vector<8x1792xf32>
    %6 = arith.addf %4, %5 : vector<8x1792xf32>
    %7 = vector.extract_strided_slice %3 {offsets = [16, 256], sizes = [8, 1792], strides = [1, 1]} : vector<72x2048xf32> to vector<8x1792xf32>
    %8 = arith.addf %6, %7 : vector<8x1792xf32>
    %c0_4 = arith.constant 0 : index
    %c0_5 = arith.constant 0 : index
    %c0_6 = arith.constant 0 : index
    %9 = vector.load %arg3[%c0_4, %c0_5, %c0_6] : memref<3x8x1xf32, #tpu.memory_space<vmem>>, vector<1x8x1xf32>
    %10 = vector.shape_cast %9 : vector<1x8x1xf32> to vector<8x1xf32>
    %11 = vector.broadcast %10 : vector<8x1xf32> to vector<8x1792xf32>
    %12 = arith.addf %8, %11 : vector<8x1792xf32>
    %cst_7 = arith.constant 0.000000e+00 : f32
    %13 = vector.broadcast %cst_7 : f32 to vector<8x1792xf32>
    %14 = arith.maximumf %12, %13 : vector<8x1792xf32>
    %c0_8 = arith.constant 0 : index
    %c0_9 = arith.constant 0 : index
    %c0_10 = arith.constant 0 : index
    %15 = vector.load %arg4[%c0_8, %c0_9, %c0_10] : memref<1x8x4608xf32, #tpu.memory_space<vmem>>, vector<1x8x1792xf32>
    %16 = vector.shape_cast %15 : vector<1x8x1792xf32> to vector<8x1792xf32>
    %17 = vector.shape_cast %14 : vector<8x1792xf32> to vector<1x8x1792xf32>
    tpu.vector_store %arg4[%c0_8, %c0_9, %c0_10], %17 {strides = array<i32>} : memref<1x8x4608xf32, #tpu.memory_space<vmem>>, vector<1x8x1792xf32>,
    %18 = vector.extract_strided_slice %3 {offsets = [24, 0], sizes = [8, 1536], strides = [1, 1]} : vector<72x2048xf32> to vector<8x1536xf32>
    %19 = vector.extract_strided_slice %3 {offsets = [32, 256], sizes = [8, 1536], strides = [1, 1]} : vector<72x2048xf32> to vector<8x1536xf32>
    %20 = arith.addf %18, %19 : vector<8x1536xf32>
    %21 = vector.extract_strided_slice %3 {offsets = [40, 512], sizes = [8, 1536], strides = [1, 1]} : vector<72x2048xf32> to vector<8x1536xf32>
    %22 = arith.addf %20, %21 : vector<8x1536xf32>
    %c1 = arith.constant 1 : index
    %c0_11 = arith.constant 0 : index
    %c0_12 = arith.constant 0 : index
    %23 = vector.load %arg3[%c1, %c0_11, %c0_12] : memref<3x8x1xf32, #tpu.memory_space<vmem>>, vector<1x8x1xf32>
    %24 = vector.shape_cast %23 : vector<1x8x1xf32> to vector<8x1xf32>
    %25 = vector.broadcast %24 : vector<8x1xf32> to vector<8x1536xf32>
    %26 = arith.addf %22, %25 : vector<8x1536xf32>
    %cst_13 = arith.constant 0.000000e+00 : f32
    %27 = vector.broadcast %cst_13 : f32 to vector<8x1536xf32>
    %28 = arith.maximumf %26, %27 : vector<8x1536xf32>
    %c0_14 = arith.constant 0 : index
    %c0_15 = arith.constant 0 : index
    %c1792 = arith.constant 1792 : index
    %29 = vector.load %arg4[%c0_14, %c0_15, %c1792] : memref<1x8x4608xf32, #tpu.memory_space<vmem>>, vector<1x8x1536xf32>
    %30 = vector.shape_cast %29 : vector<1x8x1536xf32> to vector<8x1536xf32>
    %31 = vector.shape_cast %28 : vector<8x1536xf32> to vector<1x8x1536xf32>
    tpu.vector_store %arg4[%c0_14, %c0_15, %c1792], %31 {strides = array<i32>} : memref<1x8x4608xf32, #tpu.memory_space<vmem>>, vector<1x8x1536xf32>,
    %32 = vector.extract_strided_slice %3 {offsets = [48, 0], sizes = [8, 1280], strides = [1, 1]} : vector<72x2048xf32> to vector<8x1280xf32>
    %33 = vector.extract_strided_slice %3 {offsets = [56, 384], sizes = [8, 1280], strides = [1, 1]} : vector<72x2048xf32> to vector<8x1280xf32>
    %34 = arith.addf %32, %33 : vector<8x1280xf32>
    %35 = vector.extract_strided_slice %3 {offsets = [64, 768], sizes = [8, 1280], strides = [1, 1]} : vector<72x2048xf32> to vector<8x1280xf32>
    %36 = arith.addf %34, %35 : vector<8x1280xf32>
    %c2 = arith.constant 2 : index
    %c0_16 = arith.constant 0 : index
    %c0_17 = arith.constant 0 : index
    %37 = vector.load %arg3[%c2, %c0_16, %c0_17] : memref<3x8x1xf32, #tpu.memory_space<vmem>>, vector<1x8x1xf32>
    %38 = vector.shape_cast %37 : vector<1x8x1xf32> to vector<8x1xf32>
    %39 = vector.broadcast %38 : vector<8x1xf32> to vector<8x1280xf32>
    %40 = arith.addf %36, %39 : vector<8x1280xf32>
    %cst_18 = arith.constant 0.000000e+00 : f32
    %41 = vector.broadcast %cst_18 : f32 to vector<8x1280xf32>
    %42 = arith.maximumf %40, %41 : vector<8x1280xf32>
    %c0_19 = arith.constant 0 : index
    %c0_20 = arith.constant 0 : index
    %c3328 = arith.constant 3328 : index
    %43 = vector.load %arg4[%c0_19, %c0_20, %c3328] : memref<1x8x4608xf32, #tpu.memory_space<vmem>>, vector<1x8x1280xf32>
    %44 = vector.shape_cast %43 : vector<1x8x1280xf32> to vector<8x1280xf32>
    %45 = vector.shape_cast %42 : vector<8x1280xf32> to vector<1x8x1280xf32>
    tpu.vector_store %arg4[%c0_19, %c0_20, %c3328], %45 {strides = array<i32>} : memref<1x8x4608xf32, #tpu.memory_space<vmem>>, vector<1x8x1280xf32>,
    return
  }
  func.func @transform_0(%arg0: i32) -> (i32, i32, i32) {
    %c0_i32 = arith.constant 0 : i32
    %c0_i32_0 = arith.constant 0 : i32
    %c0_i32_1 = arith.constant 0 : i32
    return %arg0, %c0_i32, %c0_i32_0 : i32, i32, i32
  }
  func.func @transform_1(%arg0: i32) -> (i32, i32) {
    %c0_i32 = arith.constant 0 : i32
    %c0_i32_0 = arith.constant 0 : i32
    %c0_i32_1 = arith.constant 0 : i32
    return %c0_i32, %c0_i32_0 : i32, i32
  }
  func.func @transform_2(%arg0: i32) -> (i32, i32, i32) {
    %c0_i32 = arith.constant 0 : i32
    %c0_i32_0 = arith.constant 0 : i32
    %c0_i32_1 = arith.constant 0 : i32
    %c0_i32_2 = arith.constant 0 : i32
    return %c0_i32, %c0_i32_0, %c0_i32_1 : i32, i32, i32
  }
  func.func @transform_3(%arg0: i32) -> (i32, i32, i32) {
    %c0_i32 = arith.constant 0 : i32
    %c0_i32_0 = arith.constant 0 : i32
    %c0_i32_1 = arith.constant 0 : i32
    return %arg0, %c0_i32, %c0_i32_0 : i32, i32, i32
  }
}

</mosaic_0001>

<bundles_post_ra>
// kernel: dilation_block_forward.1
= control target key start
LH: loop header
LB: loop body
LE: loop exit
PB: predicated region body
PF: predicated region fallthrough
CT: control target
= control target key end

     0   :  { %vm92_vm0 = vcmask 1041408   ;;  %vm76_vm1 = vcmask 31744   ;;  %v926_v22 = vmov 0   ;;  %s1415_s0 = inlined_call_operand.vmem [shape: bf16[1,4,2048], index: 0, kind: input, shape index: {}]   ;;  %s1416_s1 = inlined_call_operand.vmem [shape: bf16[72,4], index: 1, kind: input, shape index: {}]   ;;  %s1417_s2 = inlined_call_operand.vmem [shape: f32[3,8,1], index: 2, kind: input, shape index: {}]   ;;  %s1418_s3 = inlined_call_operand.vmem [shape: f32[1,8,4608], index: 3, kind: output, shape index: {}]  }
   0x1   :  { %v24_v0 = vld [vmem:[%s1415_s0] sm:$0xff]  ;;  %v25_v1 = vld [vmem:[%s1415_s0 + $0x8] sm:$0xff]  ;;  %v26_v2 = vld [vmem:[%s1415_s0 + $0x10] sm:$0xff]  ;;  %924 = vset.pattern.permute.xlu0 %v926_v22  ;;  %925 = vset.pattern.permute.xlu1 %v926_v22 }
   0x2   :  { %52 = vst [vmem:[#allocation1] ss:$4 sm:$0xff] %v24_v0  ;;  %v961_v8 = vld [vmem:[%s1416_s1] sm:$0xff]  ;;  %v27_v15 = vld [vmem:[%s1415_s0 + $0x18] sm:$0xff]  ;;  %v986_v23 = vld [vmem:[%s1416_s1 + $0x8] sm:$0xff] }
   0x3   :  { %55 = vst [vmem:[#allocation1 + $0x20] ss:$4 sm:$0xff] %v25_v1  ;;  %v645_v21 = vld [vmem:[%s1417_s2] sm:$0xff]  ;;  %v999_v24 = vld [vmem:[%s1416_s1 + $0x10] sm:$0xff]  ;;  %v1012_v25 = vld [vmem:[%s1416_s1 + $0x18] sm:$0xff] }
   0x4   :  { %648 = vperm.xlu0 %924, %v645_v21   ;;  %v23_v33 = vld [vmem:[%s1416_s1 + $0x20] sm:$0xf]  ;;  %v917_v37 = vld [vmem:[%s1417_s2 + $0x8] sm:$0xff]  ;;  %v918_v44 = vld [vmem:[%s1417_s2 + $0x10] sm:$0xff] }
   0x5   :  { %v45_v35 = vunpack.c.l.b16 %v23_v33  ;;  %784 = vperm.xlu1 %925, %v918_v44  }
   0x7   :  { %v1029_v36 = vpack.c.b16 %v45_v35, %v45_v35 }
   0x9   :  { %v56_v3 = vld.sshfl [vmem:[#allocation1] sm:$0xff pattern:$0x73625140]  ;;  %v57_v4 = vld.sshfl [vmem:[#allocation1 + $0x8] sm:$0xff pattern:$0x73625140] }
   0xa   :  { %v93_v5 = vsel %vm92_vm0, %v56_v3, 0  ;;  %v95_v6 = vsel %vm92_vm0, %v57_v4, 0  ;;  %v58_v7 = vld.sshfl [vmem:[#allocation1 + $0x10] sm:$0xff pattern:$0x73625140] }
   0xb   :  { %132 = vmatpush.bf16.msra.mxu0 %v93_v5  ;;  %159 = vmatpush.bf16.msra.mxu1 %v95_v6  ;;  %v97_v9 = vsel %vm92_vm0, %v58_v7, 0  ;;  %v59_v10 = vld.sshfl [vmem:[#allocation1 + $0x18] sm:$0xff pattern:$0x73625140] }
   0xc   :  { %187 = vmatpush.bf16.msra.mxu2 %v97_v9  ;;  %65 = vst [vmem:[#allocation1] ss:$4 sm:$0xff] %v26_v2  ;;  %v99_v11 = vsel %vm92_vm0, %v59_v10, 0  ;;  %v62_v12 = vld.sshfl [vmem:[#allocation1 + $0x30] sm:$0xff pattern:$0x73625140]  ;;  %721 = vperm.xlu0 %924, %v917_v37  }
   0xd   :  { %217 = vmatpush.bf16.msra.mxu3 %v99_v11  ;;  %v105_v13 = vsel %vm92_vm0, %v62_v12, 0  ;;  %v63_v14 = vld.sshfl [vmem:[#allocation1 + $0x38] sm:$0xff pattern:$0x73625140] }
   0xe   :  { %837 = vmatmul.msk.bf16.vlgmr.msra.gmra.mxu0 %vm76_vm1, %v961_v8  ;;  %842 = vmatmul.msk.bf16.vlgmr.msra.gmra.mxu1 %vm76_vm1, %v961_v8  ;;  %v107_v16 = vsel %vm92_vm0, %v63_v14, 0  ;;  %v60_v17 = vld.sshfl [vmem:[#allocation1 + $0x20] sm:$0xff pattern:$0x73625140] }
   0xf   :  { %847 = vmatmul.msk.bf16.vlgmr.msra.gmra.mxu2 %vm76_vm1, %v961_v8  ;;  %v101_v18 = vsel %vm92_vm0, %v60_v17, 0  ;;  %v61_v19 = vld.sshfl [vmem:[#allocation1 + $0x28] sm:$0xff pattern:$0x73625140] }
  0x10   :  { %852 = vmatmul.msk.bf16.vlgmr.msra.gmra.mxu3 %vm76_vm1, %v961_v8  ;;  %312 = vmatpush.bf16.msrb.mxu2 %v105_v13  ;;  %67 = vst [vmem:[#allocation1 + $0x20] ss:$4 sm:$0xff] %v27_v15  ;;  %v103_v20 = vsel %vm92_vm0, %v61_v19, 0 }
  0x11   :  { %345 = vmatpush.bf16.msrb.mxu3 %v107_v16  ;;  %248 = vmatpush.bf16.msrb.mxu0 %v101_v18 }
  0x12   :  { %280 = vmatpush.bf16.msrb.mxu1 %v103_v20 }
  0x13   :  { %v70_v26 = vld.sshfl [vmem:[#allocation1 + $0x10] sm:$0xff pattern:$0x73625140]  ;;  %v71_v27 = vld.sshfl [vmem:[#allocation1 + $0x18] sm:$0xff pattern:$0x73625140] }
  0x14   :  { %v113_v28 = vsel %vm92_vm0, %v70_v26, 0  ;;  %v115_v29 = vsel %vm92_vm0, %v71_v27, 0  ;;  %v68_v30 = vld.sshfl [vmem:[#allocation1] sm:$0xff pattern:$0x73625140] }
  0x15   :  { %444 = vmatpush.bf16.msra.mxu2 %v113_v28  ;;  %476 = vmatpush.bf16.msra.mxu3 %v115_v29  ;;  %v109_v31 = vsel %vm92_vm0, %v68_v30, 0  ;;  %v69_v32 = vld.sshfl [vmem:[#allocation1 + $0x8] sm:$0xff pattern:$0x73625140] }
  0x16   :  { %378 = vmatpush.bf16.msra.mxu0 %v109_v31  ;;  %v111_v34 = vsel %vm92_vm0, %v69_v32, 0 }
  0x17   :  { %411 = vmatpush.bf16.msra.mxu1 %v111_v34  ;;  %v74_v40 = vld.sshfl [vmem:[#allocation1 + $0x30] sm:$0xff pattern:$0x73625140]  ;;  %v75_v41 = vld.sshfl [vmem:[#allocation1 + $0x38] sm:$0xff pattern:$0x73625140] }
  0x18   :  { %v121_v42 = vsel %vm92_vm0, %v74_v40, 0  ;;  %v123_v43 = vsel %vm92_vm0, %v75_v41, 0  ;;  %v72_v49 = vld.sshfl [vmem:[#allocation1 + $0x20] sm:$0xff pattern:$0x73625140] }
  0x19   :  { %v73_v50 = vld.sshfl [vmem:[#allocation1 + $0x28] sm:$0xff pattern:$0x73625140]  ;;  %v117_v51 = vsel %vm92_vm0, %v72_v49, 0 }
  0x1a   :  { %v119_v52 = vsel %vm92_vm0, %v73_v50, 0 }
  0x1e   :  { %838 = vmatmul.msk.bf16.gmra.mxu0 %vm76_vm1, %v986_v23  ;;  %843 = vmatmul.msk.bf16.gmra.mxu1 %vm76_vm1, %v986_v23 }
  0x1f   :  { %848 = vmatmul.msk.bf16.gmra.mxu2 %vm76_vm1, %v986_v23 }
  0x20   :  { %853 = vmatmul.msk.bf16.gmra.mxu3 %vm76_vm1, %v986_v23 }
  0x2e   :  { %839 = vmatmul.msk.bf16.gmra.mxu0 %vm76_vm1, %v999_v24  ;;  %844 = vmatmul.msk.bf16.gmra.mxu1 %vm76_vm1, %v999_v24 }
  0x2f   :  { %849 = vmatmul.msk.bf16.gmra.mxu2 %vm76_vm1, %v999_v24 }
  0x30   :  { %854 = vmatmul.msk.bf16.gmra.mxu3 %vm76_vm1, %v999_v24 }
  0x3e   :  { %840 = vmatmul.msk.bf16.gmra.mxu0 %vm76_vm1, %v1012_v25  ;;  %845 = vmatmul.msk.bf16.gmra.mxu1 %vm76_vm1, %v1012_v25 }
  0x3f   :  { %850 = vmatmul.msk.bf16.gmra.mxu2 %vm76_vm1, %v1012_v25 }
  0x40   :  { %855 = vmatmul.msk.bf16.gmra.mxu3 %vm76_vm1, %v1012_v25 }
  0x4e   :  { %841 = vmatmul.msk.bf16.gmra.mxu0 %vm76_vm1, %v1029_v36  ;;  %846 = vmatmul.msk.bf16.gmra.mxu1 %vm76_vm1, %v1029_v36 }
  0x4f   :  { %851 = vmatmul.msk.bf16.gmra.mxu2 %vm76_vm1, %v1029_v36 }
  0x50   :  { %856 = vmatmul.msk.bf16.gmra.mxu3 %vm76_vm1, %v1029_v36 }
  0x5e   :  { %857 = vmatmul.msk.bf16.vlgmr.msrb.gmra.mxu0 %vm76_vm1, %v961_v8  ;;  %862 = vmatmul.msk.bf16.vlgmr.msrb.gmra.mxu1 %vm76_vm1, %v961_v8 }
  0x5f   :  { %867 = vmatmul.msk.bf16.vlgmr.msrb.gmra.mxu2 %vm76_vm1, %v961_v8  ;;  %508 = vmatpush.bf16.msrb.mxu0 %v117_v51 }
  0x60   :  { %872 = vmatmul.msk.bf16.vlgmr.msrb.gmra.mxu3 %vm76_vm1, %v961_v8  ;;  %569 = vmatpush.bf16.msrb.mxu2 %v121_v42 }
  0x61   :  { %597 = vmatpush.bf16.msrb.mxu3 %v123_v43  ;;  %539 = vmatpush.bf16.msrb.mxu1 %v119_v52 }
  0x6e   :  { %858 = vmatmul.msk.bf16.gmra.mxu0 %vm76_vm1, %v986_v23  ;;  %863 = vmatmul.msk.bf16.gmra.mxu1 %vm76_vm1, %v986_v23 }
  0x6f   :  { %868 = vmatmul.msk.bf16.gmra.mxu2 %vm76_vm1, %v986_v23 }
  0x70   :  { %873 = vmatmul.msk.bf16.gmra.mxu3 %vm76_vm1, %v986_v23 }
  0x76   :  { %v1093_v61 = vpop.permute.xlu0 %648 }
  0x7e   :  { %859 = vmatmul.msk.bf16.gmra.mxu0 %vm76_vm1, %v999_v24  ;;  %864 = vmatmul.msk.bf16.gmra.mxu1 %vm76_vm1, %v999_v24 }
  0x7f   :  { %869 = vmatmul.msk.bf16.gmra.mxu2 %vm76_vm1, %v999_v24 }
  0x80   :  { %874 = vmatmul.msk.bf16.gmra.mxu3 %vm76_vm1, %v999_v24 }
  0x8b   :  { %v134_v38 = vpop.f32.mrf.mxu0  ;;  %v161_v39 = vpop.f32.mrf.mxu1 }
  0x8e   :  { %860 = vmatmul.msk.bf16.gmra.mxu0 %vm76_vm1, %v1012_v25  ;;  %865 = vmatmul.msk.bf16.gmra.mxu1 %vm76_vm1, %v1012_v25 }
  0x8f   :  { %870 = vmatmul.msk.bf16.gmra.mxu2 %vm76_vm1, %v1012_v25 }
  0x90   :  { %875 = vmatmul.msk.bf16.gmra.mxu3 %vm76_vm1, %v1012_v25 }
  0x92   :  { %v189_v45 = vpop.f32.mrf.mxu2 }
  0x93   :  { %v1079_v46 = vpop.f32.mrf.mxu3  ;;  %v136_v47 = vpop.f32.mrf.mxu0 }
  0x94   :  { %v163_v48 = vpop.f32.mrf.mxu1 }
  0x95   :  { %v617_v58 = vadd.f32 %v163_v48, %v134_v38 }
  0x9a   :  { %v191_v53 = vpop.f32.mrf.mxu2 }
  0x9b   :  { %v221_v54 = vpop.f32.mrf.mxu3  ;;  %v138_v55 = vpop.f32.mrf.mxu0  ;;  %v618_v59 = vadd.f32 %v191_v53, %v161_v39 }
  0x9c   :  { %v1083_v56 = vadd.f32 %v221_v54, %v189_v45  ;;  %v166_v57 = vpop.f32.mrf.mxu1 }
  0x9e   :  { %861 = vmatmul.msk.bf16.gmra.mxu0 %vm76_vm1, %v1029_v36  ;;  %866 = vmatmul.msk.bf16.gmra.mxu1 %vm76_vm1, %v1029_v36 }
  0x9f   :  { %871 = vmatmul.msk.bf16.gmra.mxu2 %vm76_vm1, %v1029_v36 }
  0xa0   :  { %876 = vmatmul.msk.bf16.gmra.mxu3 %vm76_vm1, %v1029_v36 }
  0xa2   :  { %v194_v60 = vpop.f32.mrf.mxu2 }
  0xa3   :  { %v631_v62 = vadd.f32 %v617_v58, %v194_v60  ;;  %v224_v63 = vpop.f32.mrf.mxu3  ;;  %v139_v0 = vpop.f32.mrf.mxu0 }
  0xa4   :  { %v632_v1 = vadd.f32 %v618_v59, %v224_v63  ;;  %v167_v2 = vpop.f32.mrf.mxu1 }
  0xa5   :  { %v651_v3 = vadd.f32 %v1093_v61, %v631_v62 }
  0xa6   :  { %v652_v4 = vadd.f32 %v1093_v61, %v632_v1 }
  0xa7   :  { %v665_v5 = vmax.f32 %v651_v3, 0.0 }
  0xa8   :  { %v666_v6 = vmax.f32 %v652_v4, 0.0 }
  0xa9   :  { %679 = vst [vmem:[%s1418_s3] sm:$0xff] %v665_v5 }
  0xaa   :  { %680 = vst [vmem:[%s1418_s3 + $0x8] sm:$0xff] %v666_v6  ;;  %v1103_v7 = vpop.f32.mrf.mxu2 }
  0xab   :  { %v1105_v9 = vpop.f32.mrf.mxu3  ;;  %v142_v10 = vpop.f32.mrf.mxu0 }
  0xac   :  { %v170_v11 = vpop.f32.mrf.mxu1 }
  0xae   :  { %877 = vmatmul.msk.bf16.vlgmr.msra.gmra.mxu0 %vm76_vm1, %v961_v8  ;;  %882 = vmatmul.msk.bf16.vlgmr.msra.gmra.mxu1 %vm76_vm1, %v961_v8 }
  0xaf   :  { %887 = vmatmul.msk.bf16.vlgmr.msra.gmra.mxu2 %vm76_vm1, %v961_v8 }
  0xb0   :  { %892 = vmatmul.msk.bf16.vlgmr.msra.gmra.mxu3 %vm76_vm1, %v961_v8 }
  0xb2   :  { %v199_v12 = vpop.f32.mrf.mxu2 }
  0xb3   :  { %v1115_v13 = vadd.f32 %v199_v12, %v139_v0  ;;  %v229_v14 = vpop.f32.mrf.mxu3  ;;  %v143_v15 = vpop.f32.mrf.mxu0 }
  0xb4   :  { %v1117_v16 = vadd.f32 %v229_v14, %v167_v2  ;;  %v171_v17 = vpop.f32.mrf.mxu1 }
  0xba   :  { %v201_v18 = vpop.f32.mrf.mxu2 }
  0xbb   :  { %v231_v19 = vpop.f32.mrf.mxu3  ;;  %v145_v20 = vpop.f32.mrf.mxu0 }
  0xbc   :  { %v1119_v21 = vpop.f32.mrf.mxu1  ;;  %v1193_v18 = vpop.permute.xlu0 %721 }
  0xbe   :  { %878 = vmatmul.msk.bf16.gmra.mxu0 %vm76_vm1, %v986_v23  ;;  %883 = vmatmul.msk.bf16.gmra.mxu1 %vm76_vm1, %v986_v23 }
  0xbf   :  { %888 = vmatmul.msk.bf16.gmra.mxu2 %vm76_vm1, %v986_v23 }
  0xc0   :  { %893 = vmatmul.msk.bf16.gmra.mxu3 %vm76_vm1, %v986_v23 }
  0xc2   :  { %v1129_v22 = vpop.f32.mrf.mxu2 }
  0xc3   :  { %v1131_v26 = vpop.f32.mrf.mxu3  ;;  %v147_v27 = vpop.f32.mrf.mxu0 }
  0xc4   :  { %v175_v28 = vpop.f32.mrf.mxu1 }
  0xca   :  { %v205_v29 = vpop.f32.mrf.mxu2 }
  0xcb   :  { %v235_v30 = vpop.f32.mrf.mxu3  ;;  %v149_v31 = vpop.f32.mrf.mxu0 }
  0xcc   :  { %v1133_v32 = vadd.f32 %v235_v30, %v145_v20  ;;  %v177_v33 = vpop.f32.mrf.mxu1 }
  0xce   :  { %879 = vmatmul.msk.bf16.gmra.mxu0 %vm76_vm1, %v999_v24  ;;  %884 = vmatmul.msk.bf16.gmra.mxu1 %vm76_vm1, %v999_v24 }
  0xcf   :  { %889 = vmatmul.msk.bf16.gmra.mxu2 %vm76_vm1, %v999_v24 }
  0xd0   :  { %894 = vmatmul.msk.bf16.gmra.mxu3 %vm76_vm1, %v999_v24 }
  0xd2   :  { %v207_v34 = vpop.f32.mrf.mxu2 }
  0xd3   :  { %v238_v35 = vpop.f32.mrf.mxu3  ;;  %v150_v37 = vpop.f32.mrf.mxu0 }
  0xd4   :  { %v178_v38 = vpop.f32.mrf.mxu1 }
  0xda   :  { %v208_v39 = vpop.f32.mrf.mxu2 }
  0xdb   :  { %v239_v40 = vpop.f32.mrf.mxu3  ;;  %v250_v41 = vpop.f32.mrf.mxu0 }
  0xdc   :  { %v282_v42 = vpop.f32.mrf.mxu1 }
  0xde   :  { %880 = vmatmul.msk.bf16.gmra.mxu0 %vm76_vm1, %v1012_v25  ;;  %885 = vmatmul.msk.bf16.gmra.mxu1 %vm76_vm1, %v1012_v25 }
  0xdf   :  { %890 = vmatmul.msk.bf16.gmra.mxu2 %vm76_vm1, %v1012_v25 }
  0xe0   :  { %895 = vmatmul.msk.bf16.gmra.mxu3 %vm76_vm1, %v1012_v25 }
  0xe2   :  { %v314_v43 = vpop.f32.mrf.mxu2 }
  0xe3   :  { %v1151_v44 = vpop.f32.mrf.mxu3  ;;  %v252_v45 = vpop.f32.mrf.mxu0 }
  0xe4   :  { %v284_v47 = vpop.f32.mrf.mxu1  ;;  %v620_v49 = vadd.f32 %v252_v45, %v1079_v46 }
  0xea   :  { %v316_v48 = vpop.f32.mrf.mxu2 }
  0xeb   :  { %v349_v50 = vpop.f32.mrf.mxu3  ;;  %v255_v51 = vpop.f32.mrf.mxu0  ;;  %v622_v60 = vadd.f32 %v316_v48, %v282_v42 }
  0xec   :  { %v1154_v52 = vadd.f32 %v349_v50, %v314_v43  ;;  %v633_v53 = vadd.f32 %v1083_v56, %v255_v51  ;;  %v287_v54 = vpop.f32.mrf.mxu1  ;;  %v621_v56 = vadd.f32 %v284_v47, %v250_v41 }
  0xed   :  { %v634_v55 = vadd.f32 %v620_v49, %v287_v54 }
  0xee   :  { %v653_v57 = vadd.f32 %v1093_v61, %v633_v53  ;;  %881 = vmatmul.msk.bf16.gmra.mxu0 %vm76_vm1, %v1029_v36  ;;  %886 = vmatmul.msk.bf16.gmra.mxu1 %vm76_vm1, %v1029_v36 }
  0xef   :  { %v654_v58 = vadd.f32 %v1093_v61, %v634_v55  ;;  %891 = vmatmul.msk.bf16.gmra.mxu2 %vm76_vm1, %v1029_v36 }
  0xf0   :  { %v667_v46 = vmax.f32 %v653_v57, 0.0  ;;  %896 = vmatmul.msk.bf16.gmra.mxu3 %vm76_vm1, %v1029_v36 }
  0xf1   :  { %v668_v59 = vmax.f32 %v654_v58, 0.0 }
  0xf2   :  { %681 = vst [vmem:[%s1418_s3 + $0x10] sm:$0xff] %v667_v46  ;;  %v319_v62 = vpop.f32.mrf.mxu2  ;;  %v1248_v46 = vpop.permute.xlu1 %784 }
  0xf3   :  { %682 = vst [vmem:[%s1418_s3 + $0x18] sm:$0xff] %v668_v59  ;;  %v635_v63 = vadd.f32 %v621_v56, %v319_v62  ;;  %v352_v0 = vpop.f32.mrf.mxu3  ;;  %v257_v1 = vpop.f32.mrf.mxu0 }
  0xf4   :  { %v636_v2 = vadd.f32 %v622_v60, %v352_v0  ;;  %v289_v3 = vpop.f32.mrf.mxu1 }
  0xf5   :  { %v655_v4 = vadd.f32 %v1093_v61, %v635_v63 }
  0xf6   :  { %v656_v5 = vadd.f32 %v1093_v61, %v636_v2 }
  0xf7   :  { %v669_v6 = vmax.f32 %v655_v4, 0.0 }
  0xf8   :  { %v670_v10 = vmax.f32 %v656_v5, 0.0 }
  0xf9   :  { %683 = vst [vmem:[%s1418_s3 + $0x20] sm:$0xff] %v669_v6 }
  0xfa   :  { %684 = vst [vmem:[%s1418_s3 + $0x28] sm:$0xff] %v670_v10  ;;  %v1181_v11 = vpop.f32.mrf.mxu2 }
  0xfb   :  { %v1183_v12 = vpop.f32.mrf.mxu3  ;;  %v260_v14 = vpop.f32.mrf.mxu0 }
  0xfc   :  { %v292_v15 = vpop.f32.mrf.mxu1 }
  0xfd   :  { %v696_v38 = vadd.f32 %v292_v15, %v1105_v9 }
  0xfe   :  { %897 = vmatmul.msk.bf16.vlgmr.msrb.gmra.mxu0 %vm76_vm1, %v961_v8  ;;  %902 = vmatmul.msk.bf16.vlgmr.msrb.gmra.mxu1 %vm76_vm1, %v961_v8 }
  0xff   :  { %907 = vmatmul.msk.bf16.vlgmr.msrb.gmra.mxu2 %vm76_vm1, %v961_v8 }
 0x100   :  { %912 = vmatmul.msk.bf16.vlgmr.msrb.gmra.mxu3 %vm76_vm1, %v961_v8  ;;  %v695_v8 = vadd.f32 %v260_v14, %v1103_v7 }
 0x102   :  { %v324_v17 = vpop.f32.mrf.mxu2 }
 0x103   :  { %v1195_v19 = vadd.f32 %v324_v17, %v257_v1  ;;  %v357_v20 = vpop.f32.mrf.mxu3  ;;  %v262_v27 = vpop.f32.mrf.mxu0 }
 0x104   :  { %v1197_v28 = vadd.f32 %v357_v20, %v289_v3  ;;  %v705_v29 = vadd.f32 %v1115_v13, %v262_v27  ;;  %v294_v30 = vpop.f32.mrf.mxu1 }
 0x105   :  { %v706_v31 = vadd.f32 %v1117_v16, %v294_v30 }
 0x106   :  { %v724_v33 = vadd.f32 %v1193_v18, %v705_v29 }
 0x107   :  { %v725_v34 = vadd.f32 %v1193_v18, %v706_v31 }
 0x108   :  { %v736_v35 = vmax.f32 %v724_v33, 0.0 }
 0x109   :  { %v737_v37 = vmax.f32 %v725_v34, 0.0 }
 0x10a   :  { %748 = vst [vmem:[%s1418_s3 + $0x70] sm:$0xff] %v736_v35  ;;  %v326_v39 = vpop.f32.mrf.mxu2 }
 0x10b   :  { %749 = vst [vmem:[%s1418_s3 + $0x78] sm:$0xff] %v737_v37  ;;  %v707_v13 = vadd.f32 %v695_v8, %v326_v39  ;;  %v359_v16 = vpop.f32.mrf.mxu3  ;;  %v265_v40 = vpop.f32.mrf.mxu0 }
 0x10c   :  { %v708_v41 = vadd.f32 %v696_v38, %v359_v16  ;;  %v1211_v42 = vpop.f32.mrf.mxu1 }
 0x10d   :  { %v726_v7 = vadd.f32 %v1193_v18, %v707_v13 }
 0x10e   :  { %v727_v43 = vadd.f32 %v1193_v18, %v708_v41  ;;  %898 = vmatmul.msk.bf16.gmra.mxu0 %vm76_vm1, %v986_v23  ;;  %903 = vmatmul.msk.bf16.gmra.mxu1 %vm76_vm1, %v986_v23 }
 0x10f   :  { %v738_v9 = vmax.f32 %v726_v7, 0.0  ;;  %908 = vmatmul.msk.bf16.gmra.mxu2 %vm76_vm1, %v986_v23 }
 0x110   :  { %v739_v45 = vmax.f32 %v727_v43, 0.0  ;;  %913 = vmatmul.msk.bf16.gmra.mxu3 %vm76_vm1, %v986_v23 }
 0x111   :  { %750 = vst [vmem:[%s1418_s3 + $0x80] sm:$0xff] %v738_v9 }
 0x112   :  { %751 = vst [vmem:[%s1418_s3 + $0x88] sm:$0xff] %v739_v45  ;;  %v1229_v47 = vpop.f32.mrf.mxu2 }
 0x113   :  { %v1231_v48 = vpop.f32.mrf.mxu3  ;;  %v267_v49 = vpop.f32.mrf.mxu0 }
 0x114   :  { %v1233_v50 = vpop.f32.mrf.mxu1  ;;  %v761_v57 = vadd.f32 %v267_v49, %v1119_v21 }
 0x11a   :  { %v1235_v51 = vpop.f32.mrf.mxu2 }
 0x11b   :  { %v364_v53 = vpop.f32.mrf.mxu3  ;;  %v270_v54 = vpop.f32.mrf.mxu0 }
 0x11c   :  { %v1237_v23 = vadd.f32 %v364_v53, %v265_v40  ;;  %v302_v55 = vpop.f32.mrf.mxu1 }
 0x11e   :  { %899 = vmatmul.msk.bf16.gmra.mxu0 %vm76_vm1, %v999_v24  ;;  %904 = vmatmul.msk.bf16.gmra.mxu1 %vm76_vm1, %v999_v24 }
 0x11f   :  { %909 = vmatmul.msk.bf16.gmra.mxu2 %vm76_vm1, %v999_v24 }
 0x120   :  { %914 = vmatmul.msk.bf16.gmra.mxu3 %vm76_vm1, %v999_v24 }
 0x122   :  { %v334_v58 = vpop.f32.mrf.mxu2 }
 0x123   :  { %v770_v56 = vadd.f32 %v1133_v32, %v334_v58  ;;  %v367_v59 = vpop.f32.mrf.mxu3  ;;  %v271_v60 = vpop.f32.mrf.mxu0 }
 0x124   :  { %v771_v62 = vadd.f32 %v761_v57, %v367_v59  ;;  %v303_v63 = vpop.f32.mrf.mxu1 }
 0x125   :  { %v787_v0 = vadd.f32 %v1248_v46, %v770_v56 }
 0x126   :  { %v788_v1 = vadd.f32 %v1248_v46, %v771_v62 }
 0x127   :  { %v797_v2 = vmax.f32 %v787_v0, 0.0 }
 0x128   :  { %v798_v3 = vmax.f32 %v788_v1, 0.0 }
 0x129   :  { %807 = vst [vmem:[%s1418_s3 + $0xd0] sm:$0xff] %v797_v2 }
 0x12a   :  { %808 = vst [vmem:[%s1418_s3 + $0xd8] sm:$0xff] %v798_v3  ;;  %v336_v24 = vpop.f32.mrf.mxu2 }
 0x12b   :  { %v369_v21 = vpop.f32.mrf.mxu3  ;;  %v380_v32 = vpop.f32.mrf.mxu0 }
 0x12c   :  { %v413_v4 = vpop.f32.mrf.mxu1 }
 0x12e   :  { %900 = vmatmul.msk.bf16.gmra.mxu0 %vm76_vm1, %v1012_v25  ;;  %905 = vmatmul.msk.bf16.gmra.mxu1 %vm76_vm1, %v1012_v25 }
 0x12f   :  { %910 = vmatmul.msk.bf16.gmra.mxu2 %vm76_vm1, %v1012_v25 }
 0x130   :  { %915 = vmatmul.msk.bf16.gmra.mxu3 %vm76_vm1, %v1012_v25 }
 0x132   :  { %v446_v5 = vpop.f32.mrf.mxu2 }
 0x133   :  { %v1267_v6 = vpop.f32.mrf.mxu3  ;;  %v382_v10 = vpop.f32.mrf.mxu0 }
 0x134   :  { %v415_v14 = vpop.f32.mrf.mxu1  ;;  %v624_v17 = vadd.f32 %v382_v10, %v1151_v44 }
 0x13a   :  { %v448_v15 = vpop.f32.mrf.mxu2 }
 0x13b   :  { %v480_v20 = vpop.f32.mrf.mxu3  ;;  %v385_v27 = vpop.f32.mrf.mxu0  ;;  %v626_v8 = vadd.f32 %v448_v15, %v413_v4 }
 0x13c   :  { %v1270_v29 = vadd.f32 %v480_v20, %v446_v5  ;;  %v637_v30 = vadd.f32 %v1154_v52, %v385_v27  ;;  %v418_v31 = vpop.f32.mrf.mxu1  ;;  %v625_v52 = vadd.f32 %v415_v14, %v380_v32 }
 0x13d   :  { %v638_v33 = vadd.f32 %v624_v17, %v418_v31 }
 0x13e   :  { %v657_v34 = vadd.f32 %v1093_v61, %v637_v30  ;;  %901 = vmatmul.msk.bf16.gmra.mxu0 %vm76_vm1, %v1029_v36  ;;  %906 = vmatmul.msk.bf16.gmra.mxu1 %vm76_vm1, %v1029_v36  ;;  %v762_v30 = vadd.f32 %v1233_v50, %v1129_v22 }
 0x13f   :  { %v658_v25 = vadd.f32 %v1093_v61, %v638_v33  ;;  %911 = vmatmul.msk.bf16.gmra.mxu2 %vm76_vm1, %v1029_v36  ;;  %v763_v33 = vadd.f32 %v1235_v51, %v1131_v26 }
 0x140   :  { %v671_v44 = vmax.f32 %v657_v34, 0.0  ;;  %916 = vmatmul.msk.bf16.gmra.mxu3 %vm76_vm1, %v1029_v36 }
 0x141   :  { %v672_v35 = vmax.f32 %v658_v25, 0.0 }
 0x142   :  { %685 = vst [vmem:[%s1418_s3 + $0x30] sm:$0xff] %v671_v44  ;;  %v451_v37 = vpop.f32.mrf.mxu2 }
 0x143   :  { %686 = vst [vmem:[%s1418_s3 + $0x38] sm:$0xff] %v672_v35  ;;  %v639_v38 = vadd.f32 %v625_v52, %v451_v37  ;;  %v483_v39 = vpop.f32.mrf.mxu3  ;;  %v387_v13 = vpop.f32.mrf.mxu0 }
 0x144   :  { %v640_v16 = vadd.f32 %v626_v8, %v483_v39  ;;  %v420_v40 = vpop.f32.mrf.mxu1 }
 0x145   :  { %v659_v41 = vadd.f32 %v1093_v61, %v639_v38 }
 0x146   :  { %v660_v36 = vadd.f32 %v1093_v61, %v640_v16 }
 0x147   :  { %v673_v7 = vmax.f32 %v659_v41, 0.0 }
 0x148   :  { %v674_v43 = vmax.f32 %v660_v36, 0.0 }
 0x149   :  { %687 = vst [vmem:[%s1418_s3 + $0x40] sm:$0xff] %v673_v7 }
 0x14a   :  { %688 = vst [vmem:[%s1418_s3 + $0x48] sm:$0xff] %v674_v43  ;;  %v1297_v9 = vpop.f32.mrf.mxu2 }
 0x14b   :  { %v1299_v45 = vpop.f32.mrf.mxu3  ;;  %v390_v49 = vpop.f32.mrf.mxu0 }
 0x14c   :  { %v423_v53 = vpop.f32.mrf.mxu1  ;;  %v699_v2 = vadd.f32 %v390_v49, %v1181_v11 }
 0x14d   :  { %v700_v24 = vadd.f32 %v423_v53, %v1183_v12 }
 0x152   :  { %v456_v54 = vpop.f32.mrf.mxu2 }
 0x153   :  { %v1301_v55 = vadd.f32 %v456_v54, %v387_v13  ;;  %v488_v57 = vpop.f32.mrf.mxu3  ;;  %v392_v58 = vpop.f32.mrf.mxu0 }
 0x154   :  { %v1303_v56 = vadd.f32 %v488_v57, %v420_v40  ;;  %v709_v59 = vadd.f32 %v1195_v19, %v392_v58  ;;  %v425_v60 = vpop.f32.mrf.mxu1 }
 0x155   :  { %v710_v62 = vadd.f32 %v1197_v28, %v425_v60 }
 0x156   :  { %v728_v63 = vadd.f32 %v1193_v18, %v709_v59 }
 0x157   :  { %v729_v0 = vadd.f32 %v1193_v18, %v710_v62 }
 0x158   :  { %v740_v1 = vmax.f32 %v728_v63, 0.0 }
 0x159   :  { %v741_v3 = vmax.f32 %v729_v0, 0.0 }
 0x15a   :  { %752 = vst [vmem:[%s1418_s3 + $0x90] sm:$0xff] %v740_v1  ;;  %v458_v21 = vpop.f32.mrf.mxu2 }
 0x15b   :  { %753 = vst [vmem:[%s1418_s3 + $0x98] sm:$0xff] %v741_v3  ;;  %v711_v19 = vadd.f32 %v699_v2, %v458_v21  ;;  %v490_v28 = vpop.f32.mrf.mxu3  ;;  %v395_v32 = vpop.f32.mrf.mxu0 }
 0x15c   :  { %v712_v4 = vadd.f32 %v700_v24, %v490_v28  ;;  %v1317_v5 = vpop.f32.mrf.mxu1 }
 0x15d   :  { %v730_v11 = vadd.f32 %v1193_v18, %v711_v19 }
 0x15e   :  { %v731_v10 = vadd.f32 %v1193_v18, %v712_v4 }
 0x15f   :  { %v742_v12 = vmax.f32 %v730_v11, 0.0 }
 0x160   :  { %v743_v14 = vmax.f32 %v731_v10, 0.0 }
 0x161   :  { %754 = vst [vmem:[%s1418_s3 + $0xa0] sm:$0xff] %v742_v12 }
 0x162   :  { %755 = vst [vmem:[%s1418_s3 + $0xa8] sm:$0xff] %v743_v14  ;;  %v461_v15 = vpop.f32.mrf.mxu2 }
 0x163   :  { %v493_v17 = vpop.f32.mrf.mxu3  ;;  %v397_v20 = vpop.f32.mrf.mxu0 }
 0x164   :  { %v1327_v27 = vpop.f32.mrf.mxu1  ;;  %v765_v22 = vadd.f32 %v397_v20, %v1211_v42 }
 0x16a   :  { %v1331_v31 = vpop.f32.mrf.mxu2 }
 0x16b   :  { %v494_v34 = vpop.f32.mrf.mxu3  ;;  %v400_v25 = vpop.f32.mrf.mxu0 }
 0x16c   :  { %v1335_v44 = vadd.f32 %v494_v34, %v395_v32  ;;  %v772_v52 = vadd.f32 %v762_v30, %v400_v25  ;;  %v433_v35 = vpop.f32.mrf.mxu1 }
 0x16d   :  { %v773_v8 = vadd.f32 %v763_v33, %v433_v35 }
 0x16e   :  { %v789_v37 = vadd.f32 %v1248_v46, %v772_v52 }
 0x16f   :  { %v790_v38 = vadd.f32 %v1248_v46, %v773_v8 }
 0x170   :  { %v799_v39 = vmax.f32 %v789_v37, 0.0 }
 0x171   :  { %v800_v13 = vmax.f32 %v790_v38, 0.0 }
 0x172   :  { %809 = vst [vmem:[%s1418_s3 + $0xe0] sm:$0xff] %v799_v39  ;;  %v465_v26 = vpop.f32.mrf.mxu2 }
 0x173   :  { %810 = vst [vmem:[%s1418_s3 + $0xe8] sm:$0xff] %v800_v13  ;;  %v774_v50 = vadd.f32 %v1237_v23, %v465_v26  ;;  %v497_v51 = vpop.f32.mrf.mxu3  ;;  %v402_v16 = vpop.f32.mrf.mxu0 }
 0x174   :  { %v775_v40 = vadd.f32 %v765_v22, %v497_v51  ;;  %v435_v41 = vpop.f32.mrf.mxu1 }
 0x175   :  { %v791_v36 = vadd.f32 %v1248_v46, %v774_v50 }
 0x176   :  { %v792_v7 = vadd.f32 %v1248_v46, %v775_v40 }
 0x177   :  { %v801_v42 = vmax.f32 %v791_v36, 0.0 }
 0x178   :  { %v802_v43 = vmax.f32 %v792_v7, 0.0 }
 0x179   :  { %811 = vst [vmem:[%s1418_s3 + $0xf0] sm:$0xff] %v801_v42 }
 0x17a   :  { %812 = vst [vmem:[%s1418_s3 + $0xf8] sm:$0xff] %v802_v43  ;;  %v467_v49 = vpop.f32.mrf.mxu2 }
 0x17b   :  { %v499_v23 = vpop.f32.mrf.mxu3  ;;  %v510_v53 = vpop.f32.mrf.mxu0 }
 0x17c   :  { %v541_v54 = vpop.f32.mrf.mxu1 }
 0x182   :  { %v571_v57 = vpop.f32.mrf.mxu2 }
 0x183   :  { %v599_v58 = vpop.f32.mrf.mxu3  ;;  %v512_v59 = vpop.f32.mrf.mxu0 }
 0x184   :  { %v543_v60 = vpop.f32.mrf.mxu1  ;;  %v628_v63 = vadd.f32 %v512_v59, %v1267_v6  ;;  %v766_v58 = vadd.f32 %v1327_v27, %v1229_v47 }
 0x185   :  { %v629_v32 = vadd.f32 %v543_v60, %v510_v53 }
 0x18a   :  { %v572_v62 = vpop.f32.mrf.mxu2 }
 0x18b   :  { %v600_v0 = vpop.f32.mrf.mxu3  ;;  %v515_v1 = vpop.f32.mrf.mxu0  ;;  %v630_v11 = vadd.f32 %v572_v62, %v541_v54 }
 0x18c   :  { %v641_v2 = vadd.f32 %v1270_v29, %v515_v1  ;;  %v546_v3 = vpop.f32.mrf.mxu1 }
 0x18d   :  { %v642_v24 = vadd.f32 %v628_v63, %v546_v3 }
 0x18e   :  { %v661_v21 = vadd.f32 %v1093_v61, %v641_v2 }
 0x18f   :  { %v662_v19 = vadd.f32 %v1093_v61, %v642_v24 }
 0x190   :  { %v675_v28 = vmax.f32 %v661_v21, 0.0 }
 0x191   :  { %v676_v4 = vmax.f32 %v662_v19, 0.0 }
 0x192   :  { %689 = vst [vmem:[%s1418_s3 + $0x50] sm:$0xff] %v675_v28  ;;  %v575_v10 = vpop.f32.mrf.mxu2 }
 0x193   :  { %690 = vst [vmem:[%s1418_s3 + $0x58] sm:$0xff] %v676_v4  ;;  %v643_v6 = vadd.f32 %v629_v32, %v575_v10  ;;  %v602_v29 = vpop.f32.mrf.mxu3  ;;  %v517_v12 = vpop.f32.mrf.mxu0 }
 0x194   :  { %v644_v14 = vadd.f32 %v630_v11, %v602_v29  ;;  %v548_v15 = vpop.f32.mrf.mxu1 }
 0x195   :  { %v663_v17 = vadd.f32 %v1093_v61, %v643_v6 }
 0x196   :  { %v664_v20 = vadd.f32 %v1093_v61, %v644_v14 }
 0x197   :  { %v677_v30 = vmax.f32 %v663_v17, 0.0 }
 0x198   :  { %v678_v33 = vmax.f32 %v664_v20, 0.0 }
 0x199   :  { %691 = vst [vmem:[%s1418_s3 + $0x60] sm:$0xff] %v677_v30 }
 0x19a   :  { %692 = vst [vmem:[%s1418_s3 + $0x68] sm:$0xff] %v678_v33  ;;  %v577_v34 = vpop.f32.mrf.mxu2 }
 0x19b   :  { %v604_v25 = vpop.f32.mrf.mxu3  ;;  %v519_v52 = vpop.f32.mrf.mxu0 }
 0x19c   :  { %v550_v35 = vpop.f32.mrf.mxu1  ;;  %v703_v51 = vadd.f32 %v519_v52, %v1297_v9 }
 0x19d   :  { %v704_v40 = vadd.f32 %v550_v35, %v1299_v45 }
 0x1a2   :  { %v579_v8 = vpop.f32.mrf.mxu2 }
 0x1a3   :  { %v606_v37 = vpop.f32.mrf.mxu3  ;;  %v521_v38 = vpop.f32.mrf.mxu0 }
 0x1a4   :  { %v713_v39 = vadd.f32 %v1301_v55, %v521_v38  ;;  %v552_v61 = vpop.f32.mrf.mxu1 }
 0x1a5   :  { %v714_v13 = vadd.f32 %v1303_v56, %v552_v61 }
 0x1a6   :  { %v732_v22 = vadd.f32 %v1193_v18, %v713_v39 }
 0x1a7   :  { %v733_v26 = vadd.f32 %v1193_v18, %v714_v13 }
 0x1a8   :  { %v744_v50 = vmax.f32 %v732_v22, 0.0 }
 0x1a9   :  { %v745_v16 = vmax.f32 %v733_v26, 0.0 }
 0x1aa   :  { %756 = vst [vmem:[%s1418_s3 + $0xb0] sm:$0xff] %v744_v50  ;;  %v580_v41 = vpop.f32.mrf.mxu2 }
 0x1ab   :  { %757 = vst [vmem:[%s1418_s3 + $0xb8] sm:$0xff] %v745_v16  ;;  %v715_v55 = vadd.f32 %v703_v51, %v580_v41  ;;  %v607_v56 = vpop.f32.mrf.mxu3  ;;  %v524_v36 = vpop.f32.mrf.mxu0 }
 0x1ac   :  { %v716_v7 = vadd.f32 %v704_v40, %v607_v56  ;;  %v555_v42 = vpop.f32.mrf.mxu1 }
 0x1ad   :  { %v734_v43 = vadd.f32 %v1193_v18, %v715_v55 }
 0x1ae   :  { %v735_v9 = vadd.f32 %v1193_v18, %v716_v7  ;;  %v767_v18 = vadd.f32 %v1331_v31, %v1231_v48 }
 0x1af   :  { %v746_v49 = vmax.f32 %v734_v43, 0.0 }
 0x1b0   :  { %v747_v45 = vmax.f32 %v735_v9, 0.0 }
 0x1b1   :  { %758 = vst [vmem:[%s1418_s3 + $0xc0] sm:$0xff] %v746_v49 }
 0x1b2   :  { %759 = vst [vmem:[%s1418_s3 + $0xc8] sm:$0xff] %v747_v45  ;;  %v583_v23 = vpop.f32.mrf.mxu2 }
 0x1b3   :  { %v610_v53 = vpop.f32.mrf.mxu3  ;;  %v525_v54 = vpop.f32.mrf.mxu0 }
 0x1b4   :  { %v556_v57 = vpop.f32.mrf.mxu1  ;;  %v769_v19 = vadd.f32 %v525_v54, %v1317_v5 }
 0x1ba   :  { %v584_v59 = vpop.f32.mrf.mxu2 }
 0x1bb   :  { %v611_v60 = vpop.f32.mrf.mxu3  ;;  %v528_v62 = vpop.f32.mrf.mxu0 }
 0x1bc   :  { %v776_v63 = vadd.f32 %v766_v58, %v528_v62  ;;  %v558_v0 = vpop.f32.mrf.mxu1 }
 0x1bd   :  { %v777_v1 = vadd.f32 %v767_v18, %v558_v0 }
 0x1be   :  { %v793_v2 = vadd.f32 %v1248_v46, %v776_v63 }
 0x1bf   :  { %v794_v3 = vadd.f32 %v1248_v46, %v777_v1 }
 0x1c0   :  { %v803_v24 = vmax.f32 %v793_v2, 0.0 }
 0x1c1   :  { %v804_v21 = vmax.f32 %v794_v3, 0.0 }
 0x1c2   :  { %813 = vst [vmem:[%s1418_s3 + $0x100] sm:$0xff] %v803_v24  ;;  %v586_v47 = vpop.f32.mrf.mxu2 }
 0x1c3   :  { %814 = vst [vmem:[%s1418_s3 + $0x108] sm:$0xff] %v804_v21  ;;  %v778_v48 = vadd.f32 %v1335_v44, %v586_v47  ;;  %v613_v27 = vpop.f32.mrf.mxu3  ;;  %v530_v31 = vpop.f32.mrf.mxu0 }
 0x1c4   :  { %v779_v28 = vadd.f32 %v769_v19, %v613_v27  ;;  %v560_v32 = vpop.f32.mrf.mxu1 }
 0x1c5   :  { %v795_v4 = vadd.f32 %v1248_v46, %v778_v48 }
 0x1c6   :  { %v796_v11 = vadd.f32 %v1248_v46, %v779_v28 }
 0x1c7   :  { %v805_v5 = vmax.f32 %v795_v4, 0.0 }
 0x1c8   :  { %v806_v10 = vmax.f32 %v796_v11, 0.0 }
 0x1c9   :  { %815 = vst [vmem:[%s1418_s3 + $0x110] sm:$0xff] %v805_v5 }
 0x1ca   :  { %816 = vst [vmem:[%s1418_s3 + $0x118] sm:$0xff] %v806_v10  ;;  %v588_v6 = vpop.f32.mrf.mxu2 }
 0x1cb   :  { %v615_v44 = vpop.f32.mrf.mxu3 }

</bundles_post_ra>
